<compile_context>
chip_gen: v6e
topology: v6e:2x2x1
jax: 0.10.0
libtpu: 0.0.40
codegen_flags: <defaults>
</compile_context>

<pallas_src>
import functools
from typing import Set, Tuple

import numpy as np
import jax
import jax.numpy as jnp
from jax import lax
from jax.experimental import pallas as pl
from jax.experimental.pallas import tpu as pltpu


# ----------------------------------------------------------------------------
# Host-side log-uniform candidate sampler (same algorithm as the torch module).
# This is an inherently sequential, data-dependent rejection loop -> host only.
# ----------------------------------------------------------------------------
def _choice(num_words: int, num_samples: int, rng: np.random.RandomState
            ) -> Tuple[np.ndarray, int]:
    num_tries = 0
    num_chosen = 0

    def get_buffer() -> np.ndarray:
        log_samples = rng.rand(num_samples) * np.log(num_words + 1)
        samples = np.exp(log_samples).astype("int64") - 1
        return np.clip(samples, a_min=0, a_max=num_words - 1)

    sample_buffer = get_buffer()
    buffer_index = 0
    samples: Set[int] = set()
    while num_chosen < num_samples:
        num_tries += 1
        sample_id = sample_buffer[buffer_index]
        if sample_id not in samples:
            samples.add(sample_id)
            num_chosen += 1
        buffer_index += 1
        if buffer_index == num_samples:
            sample_buffer = get_buffer()
            buffer_index = 0
    return np.array(list(samples)), num_tries


def _round_up(x: int, m: int) -> int:
    return ((x + m - 1) // m) * m


# ----------------------------------------------------------------------------
# Pallas kernel: one batch tile of the sampled-softmax NLL loss.
#   bsz            : static python int (true batch size, for the ragged mask)
#   tgt_sm_ref     : (B,) int32 in SMEM (scalar prefetch) — gather indices
#   emb_ref        : (TB, D)   bf16
#   tgt_ref        : (TB, 1)   int32   (for the collision mask)
#   badj_ref       : (TB, 1)   f32     b[tgt] - log(tgt_expected_count + 1e-7)
#   samp_w_ref     : (S, D)    bf16    (grid-invariant)
#   samp_badj_ref  : (1, S)    f32     b[sid] - log(samp_expected_count + 1e-7)
#   sid_ref        : (1, S)    int32
#   w_hbm_ref      : (V, D)    f32     raw HBM ref (memory_space=pl.ANY)
#   out_ref        : (1, 8, 128) lane-dense partial-sum block for this tile
#   true_w_buf     : (TB, D)   f32 VMEM scratch (gather destination)
#   gather_sem     : DMA semaphore shared by the per-row gather copies
# ----------------------------------------------------------------------------
def _sampled_softmax_kernel(bsz,
                            tgt_sm_ref,
                            emb_ref, tgt_ref, badj_ref,
                            samp_w_ref, samp_badj_ref, sid_ref,
                            w_hbm_ref,
                            out_ref,
                            true_w_buf, gather_sem):
    tb_rows = emb_ref.shape[0]
    row0 = pl.program_id(0) * tb_rows

    # 1) Kick off the per-row gather softmax_w[targets] (HBM -> VMEM).
    def _issue(r, carry):
        g = jnp.minimum(row0 + r, bsz - 1)         # clamp: ragged last tile
        tid = tgt_sm_ref[g]
        pltpu.make_async_copy(w_hbm_ref.at[pl.ds(tid, 1), :],
                              true_w_buf.at[pl.ds(r, 1), :],
                              gather_sem).start()
        return carry
    lax.fori_loop(0, tb_rows, _issue, 0)

    # 2) Sampled logits on the MXU while the gather DMAs are in flight.
    emb_bf = emb_ref[...]                                          # (TB, D) bf16
    sampled_logits = lax.dot_general(
        emb_bf, samp_w_ref[...],
        dimension_numbers=(((1,), (1,)), ((), ())),                # contract D
        preferred_element_type=jnp.float32)                        # (TB, S) f32
    sampled_logits = sampled_logits + samp_badj_ref[...]
    # mask sampled ids that collide with the true target (pad columns use id=-1)
    sampled_logits = jnp.where(sid_ref[...] == tgt_ref[...],
                               jnp.float32(-10000.0), sampled_logits)

    # 3) Drain the gather, then the true-logit path (f32 elementwise).
    def _drain(r, carry):
        pltpu.make_async_copy(w_hbm_ref.at[pl.ds(0, 1), :],
                              true_w_buf.at[pl.ds(0, 1), :],
                              gather_sem).wait()
        return carry
    lax.fori_loop(0, tb_rows, _drain, 0)

    emb_f32 = emb_bf.astype(jnp.float32)
    true_logits = (jnp.sum(true_w_buf[...] * emb_f32, axis=1, keepdims=True)
                   + badj_ref[...])                                # (TB, 1)

    # 4) -log_softmax[:, 0] == logsumexp(all logits) - true_logit
    m = jnp.maximum(jnp.max(sampled_logits, axis=1, keepdims=True), true_logits)
    sum_exp = (jnp.exp(true_logits - m)
               + jnp.sum(jnp.exp(sampled_logits - m), axis=1, keepdims=True))
    row_loss = m + jnp.log(sum_exp) - true_logits                  # (TB, 1)

    # 5) Mask the ragged last tile's padded rows and reduce (lane-dense store).
    ridx = row0 + lax.broadcasted_iota(jnp.int32, (tb_rows, 1), 0)
    row_loss = jnp.where(ridx < bsz, row_loss, jnp.float32(0.0))
    tile_loss = jnp.sum(row_loss)
    out_ref[...] = jnp.broadcast_to(tile_loss, out_ref.shape).astype(jnp.float32)


# ----------------------------------------------------------------------------
# Wrapper: sampled-side constants, S padding, tiling, pallas_call plumbing.
# ----------------------------------------------------------------------------
def sampled_softmax_loss(embeddings, targets, softmax_w, softmax_b,
                         sampled_ids, num_tries, num_words, *, block_b=512):
    B, D = embeddings.shape
    if B == 0:
        return jnp.float32(0.0)
    S = int(sampled_ids.shape[0])
    S_pad = _round_up(max(S, 128), 128)          # lane-dense sampled dimension

    log_nw = float(np.log(num_words + 1))
    targets = targets.astype(jnp.int32)
    sampled_ids = sampled_ids.astype(jnp.int32)
    nt_f = jnp.asarray(num_tries, jnp.float32)   # traced -> no recompile per step

    # per-row true-logit bias:  b[tgt] - log(target_expected_count + 1e-7)
    tgt_f = targets.astype(jnp.float32)
    tgt_p = jnp.log((tgt_f + 2.0) / (tgt_f + 1.0)) / log_nw
    tgt_ec = -jnp.expm1(nt_f * jnp.log1p(-tgt_p))
    true_badj = (softmax_b[targets] - jnp.log(tgt_ec + 1e-7))[:, None]   # (B, 1)

    # sampled-side constants (only S rows -> the XLA gather here is negligible
    # next to the batch stream; the big (B, D) gather is done in the kernel)
    sid_f = sampled_ids.astype(jnp.float32)
    sid_p = jnp.log((sid_f + 2.0) / (sid_f + 1.0)) / log_nw
    sid_ec = -jnp.expm1(nt_f * jnp.log1p(-sid_p))
    samp_badj = softmax_b[sampled_ids] - jnp.log(sid_ec + 1e-7)          # (S,)
    samp_w = softmax_w[sampled_ids].astype(jnp.bfloat16)                 # (S, D)

    pad_s = S_pad - S
    if pad_s:
        samp_w = jnp.pad(samp_w, ((0, pad_s), (0, 0)))                   # zero rows
        samp_badj = jnp.pad(samp_badj, (0, pad_s), constant_values=-1e4)  # exp->0
        sid = jnp.pad(sampled_ids, (0, pad_s), constant_values=-1)       # != target
    else:
        sid = sampled_ids
    samp_badj = samp_badj[None, :].astype(jnp.float32)   # (1, S_pad)
    sid = sid[None, :]                                   # (1, S_pad)

    emb_bf = embeddings.astype(jnp.bfloat16)             # halve the HBM stream
    tgt2d = targets[:, None]                             # (B, 1)

    # batch tile size: multiple of 8, capped by a v7x-safe VMEM budget
    tb = max(8, min(_round_up(int(block_b), 8), _round_up(B, 8)))

    def vmem_est(t):
        return (2 * t * D * 2            # emb bf16, double-buffered
                + 2 * S_pad * D * 2      # samp_w bf16 (invariant, 2 bufs)
                + t * D * 4              # true_w gather scratch
                + 2 * 2 * t * 128 * 4    # two narrow (t,1) blocks, lane-padded
                + 2 * 2 * 8 * S_pad * 4  # two (1,S_pad) blocks, sublane-padded
                + 2 * 8 * 128 * 4)       # output block
    while tb > 8 and vmem_est(tb) > 40 * 1024 * 1024:
        tb = max(8, _round_up(tb // 2, 8))
    n_tiles = -(-B // tb)                                # ceil(B / tb), no jnp.pad

    kernel = functools.partial(_sampled_softmax_kernel, B)

    grid_spec = pltpu.PrefetchScalarGridSpec(
        num_scalar_prefetch=1,                           # targets -> SMEM
        grid=(n_tiles,),
        in_specs=[
            pl.BlockSpec((tb, D), lambda i, t: (i, 0)),      # embeddings (bf16)
            pl.BlockSpec((tb, 1), lambda i, t: (i, 0)),      # target ids
            pl.BlockSpec((tb, 1), lambda i, t: (i, 0)),      # true bias adj
            pl.BlockSpec((S_pad, D), lambda i, t: (0, 0)),   # sampled weights
            pl.BlockSpec((1, S_pad), lambda i, t: (0, 0)),   # sampled bias adj
            pl.BlockSpec((1, S_pad), lambda i, t: (0, 0)),   # sampled ids
            pl.BlockSpec(memory_space=pl.ANY),               # softmax_w (HBM)
        ],
        out_specs=pl.BlockSpec((1, 8, 128), lambda i, t: (i, 0, 0)),
        scratch_shapes=[pltpu.VMEM((tb, D), jnp.float32),    # true_w gather buf
                        pltpu.SemaphoreType.DMA],            # shared gather sem
    )

    vmem_limit = int(min(64 * 1024 * 1024,
                         max(32 * 1024 * 1024, 4 * vmem_est(tb))))

    partials = pl.pallas_call(
        kernel,
        out_shape=jax.ShapeDtypeStruct((n_tiles, 8, 128), jnp.float32),
        grid_spec=grid_spec,
        compiler_params=pltpu.CompilerParams(
            dimension_semantics=("parallel",),
            vmem_limit_bytes=vmem_limit),
    )(targets, emb_bf, tgt2d, true_badj, samp_w, samp_badj, sid, softmax_w)

    return partials[:, 0, 0].sum()


# ----------------------------------------------------------------------------
# Pure-numpy reference (mirrors torch _forward_train exactly).
# ----------------------------------------------------------------------------
def reference_loss(embeddings, targets, softmax_w, softmax_b,
                   sampled_ids, num_tries, num_words):
    emb = np.asarray(embeddings, np.float64)
    w = np.asarray(softmax_w, np.float64)
    b = np.asarray(softmax_b, np.float64)
    tgt = np.asarray(targets, np.int64)
    sid = np.asarray(sampled_ids, np.int64)
    lognw = np.log(num_words + 1)

    tgt_p = np.log((tgt + 2.0) / (tgt + 1.0)) / lognw
    tgt_ec = -(np.exp(num_tries * np.log1p(-tgt_p)) - 1.0)
    sid_p = np.log((sid + 2.0) / (sid + 1.0)) / lognw
    sid_ec = -(np.exp(num_tries * np.log1p(-sid_p)) - 1.0)

    true_w = w[tgt]
    samp_w = w[sid]
    true_logits = (true_w * emb).sum(1) + b[tgt] - np.log(tgt_ec + 1e-7)
    sampled_logits = emb @ samp_w.T + b[sid] - np.log(sid_ec + 1e-7)
    mask = sid[None, :] == tgt[:, None]
    sampled_logits = np.where(mask, -10000.0, sampled_logits)
    logits = np.concatenate([true_logits[:, None], sampled_logits], axis=1)
    m = logits.max(1, keepdims=True)
    lse = m + np.log(np.exp(logits - m).sum(1, keepdims=True))
    log_softmax0 = logits[:, 0] - lse[:, 0]
    return -log_softmax0.sum()


if __name__ == "__main__":
    # SampledSoftmaxLayer(embedding_dim=128, num_words=512, num_samples=64, ...)
    # B=40 with block_b=16 -> 3 batch tiles, last tile ragged (8 valid rows).
    B, D, V, S = 40, 128, 512, 64

    key = jax.random.PRNGKey(0)
    k_w, k_b, k_emb, k_tgt = jax.random.split(key, 4)
    softmax_w = (jax.random.normal(k_w, (V, D), jnp.float32)
                 / np.sqrt(D)).astype(jnp.float32)
    softmax_b = 0.1 * jax.random.normal(k_b, (V,), jnp.float32)
    embeddings = jax.random.normal(k_emb, (B, D), jnp.float32)
    targets = jax.random.randint(k_tgt, (B,), 0, V, dtype=jnp.int32)

    # deterministic host-side candidate sampling (log-uniform, no replacement)
    rng = np.random.RandomState(0)
    sampled_np, num_tries = _choice(V, S, rng)
    sampled_ids = jnp.asarray(sampled_np.astype(np.int32))

    loss = sampled_softmax_loss(embeddings, targets, softmax_w, softmax_b,
                                sampled_ids, num_tries, V, block_b=16)
    loss = jax.block_until_ready(loss)

    ref = reference_loss(np.asarray(embeddings), np.asarray(targets),
                         np.asarray(softmax_w), np.asarray(softmax_b),
                         sampled_np, num_tries, V)
    # bf16 MXU operands -> slightly looser tolerance than the f32 version
    np.testing.assert_allclose(np.asarray(loss), ref, rtol=1.5e-2, atol=0.5)

    print("KERNEL_OK")
</pallas_src>

<mosaic_0001>
module attributes {stable_mosaic.version = 11 : i64} {
  func.func @_sampled_softmax_kernel(%arg0: i32, %arg1: memref<40xi32, #tpu.memory_space<smem>>, %arg2: memref<16x128xbf16, #tpu.memory_space<vmem>>, %arg3: memref<16x1xi32, #tpu.memory_space<vmem>>, %arg4: memref<16x1xf32, #tpu.memory_space<vmem>>, %arg5: memref<128x128xbf16, #tpu.memory_space<vmem>>, %arg6: memref<1x128xf32, #tpu.memory_space<vmem>>, %arg7: memref<1x128xi32, #tpu.memory_space<vmem>>, %arg8: memref<512x128xf32, #tpu.memory_space<any>>, %arg9: memref<1x8x128xf32, #tpu.memory_space<vmem>>, %arg10: memref<16x128xf32, #tpu.memory_space<vmem>>, %arg11: memref<!tpu.dma_semaphore, #tpu.memory_space<semaphore_mem>>) attributes {dimension_semantics = [#tpu.dimension_semantics<parallel>], iteration_bounds = array<i64: 3>, scalar_prefetch = 1 : i64, scratch_operands = 2 : i64, tpu.core_type = #tpu.core_type<tc>, window_params = [{transform_indices = @transform_0, window_bounds = array<i64: 16, 128>}, {transform_indices = @transform_1, window_bounds = array<i64: 16, 1>}, {transform_indices = @transform_2, window_bounds = array<i64: 16, 1>}, {pipeline_mode = #tpu.pipeline_mode<synchronous>, transform_indices = @transform_3, window_bounds = array<i64: 128, 128>}, {pipeline_mode = #tpu.pipeline_mode<synchronous>, transform_indices = @transform_4, window_bounds = array<i64: 1, 128>}, {pipeline_mode = #tpu.pipeline_mode<synchronous>, transform_indices = @transform_5, window_bounds = array<i64: 1, 128>}, {}, {transform_indices = @transform_7, window_bounds = array<i64: 1, 8, 128>}]} {
    %c16_i32 = arith.constant 16 : i32
    %0 = arith.muli %arg0, %c16_i32 : i32
    %c0_i32 = arith.constant 0 : i32
    %c16_i32_0 = arith.constant 16 : i32
    %1 = arith.addi %c0_i32, %c16_i32_0 : i32
    %c1_i32 = arith.constant 1 : i32
    scf.for %arg12 = %c0_i32 to %1 step %c1_i32  : i32 {
      %50 = arith.addi %0, %arg12 : i32
      %c39_i32 = arith.constant 39 : i32
      %51 = arith.minsi %50, %c39_i32 : i32
      %52 = arith.index_cast %51 : i32 to index
      %53 = memref.load %arg1[%52] : memref<40xi32, #tpu.memory_space<smem>>
      %c0_i32_27 = arith.constant 0 : i32
      %54 = tpu.memref_slice %arg8[%53, %c0_i32_27] : memref<512x128xf32, #tpu.memory_space<any>> -> memref<1x128xf32, #tpu.memory_space<any>>
      %c0_i32_28 = arith.constant 0 : i32
      %55 = tpu.memref_slice %arg10[%arg12, %c0_i32_28] : memref<16x128xf32, #tpu.memory_space<vmem>> -> memref<1x128xf32, #tpu.memory_space<vmem>>
      tpu.enqueue_dma source(%54 : memref<1x128xf32, #tpu.memory_space<any>>) target(%55 : memref<1x128xf32, #tpu.memory_space<vmem>>) target_semaphore(%arg11 : memref<!tpu.dma_semaphore, #tpu.memory_space<semaphore_mem>>)
    }
    %c16_i32_1 = arith.constant 16 : i32
    %c0 = arith.constant 0 : index
    %c0_2 = arith.constant 0 : index
    %2 = vector.load %arg2[%c0, %c0_2] : memref<16x128xbf16, #tpu.memory_space<vmem>>, vector<16x128xbf16>
    %c0_3 = arith.constant 0 : index
    %c0_4 = arith.constant 0 : index
    %3 = vector.load %arg5[%c0_3, %c0_4] : memref<128x128xbf16, #tpu.memory_space<vmem>>, vector<128x128xbf16>
    %cst = arith.constant dense<0.000000e+00> : vector<16x128xf32>
    %4 = tpu.matmul %2, %3, %cst {dimension_numbers = #tpu.dot_dimension_numbers<[1], [1], [0], [0], [0, 0, 1, 0], [], []>} : vector<16x128xbf16>, vector<128x128xbf16>, vector<16x128xf32> -> vector<16x128xf32>
    %c0_5 = arith.constant 0 : index
    %c0_6 = arith.constant 0 : index
    %5 = vector.load %arg6[%c0_5, %c0_6] : memref<1x128xf32, #tpu.memory_space<vmem>>, vector<1x128xf32>
    %6 = vector.broadcast %5 : vector<1x128xf32> to vector<16x128xf32>
    %7 = arith.addf %4, %6 : vector<16x128xf32>
    %c0_7 = arith.constant 0 : index
    %c0_8 = arith.constant 0 : index
    %8 = vector.load %arg7[%c0_7, %c0_8] : memref<1x128xi32, #tpu.memory_space<vmem>>, vector<1x128xi32>
    %c0_9 = arith.constant 0 : index
    %c0_10 = arith.constant 0 : index
    %9 = vector.load %arg3[%c0_9, %c0_10] : memref<16x1xi32, #tpu.memory_space<vmem>>, vector<16x1xi32>
    %10 = vector.broadcast %8 : vector<1x128xi32> to vector<16x128xi32>
    %11 = vector.broadcast %9 : vector<16x1xi32> to vector<16x128xi32>
    %12 = arith.cmpi eq, %10, %11 : vector<16x128xi32>
    %cst_11 = arith.constant -1.000000e+04 : f32
    %13 = vector.broadcast %cst_11 : f32 to vector<16x128xf32>
    %14 = arith.select %12, %13, %7 : vector<16x128xi1>, vector<16x128xf32>
    %c0_i32_12 = arith.constant 0 : i32
    %c16_i32_13 = arith.constant 16 : i32
    %15 = arith.addi %c0_i32_12, %c16_i32_13 : i32
    %c1_i32_14 = arith.constant 1 : i32
    scf.for %arg12 = %c0_i32_12 to %15 step %c1_i32_14  : i32 {
      %c0_i32_27 = arith.constant 0 : i32
      %c0_i32_28 = arith.constant 0 : i32
      %50 = tpu.memref_slice %arg8[%c0_i32_27, %c0_i32_28] : memref<512x128xf32, #tpu.memory_space<any>> -> memref<1x128xf32, #tpu.memory_space<any>>
      %c0_i32_29 = arith.constant 0 : i32
      %c0_i32_30 = arith.constant 0 : i32
      %51 = tpu.memref_slice %arg10[%c0_i32_29, %c0_i32_30] : memref<16x128xf32, #tpu.memory_space<vmem>> -> memref<1x128xf32, #tpu.memory_space<vmem>>
      tpu.wait_dma2 semaphore(%arg11 : memref<!tpu.dma_semaphore, #tpu.memory_space<semaphore_mem>>) src(%50 : memref<1x128xf32, #tpu.memory_space<any>>) dst(%51 : memref<1x128xf32, #tpu.memory_space<vmem>>)
    }
    %16 = arith.extf %2 : vector<16x128xbf16> to vector<16x128xf32>
    %c0_15 = arith.constant 0 : index
    %c0_16 = arith.constant 0 : index
    %17 = vector.load %arg10[%c0_15, %c0_16] : memref<16x128xf32, #tpu.memory_space<vmem>>, vector<16x128xf32>
    %18 = arith.mulf %17, %16 : vector<16x128xf32>
    %cst_17 = arith.constant dense<0.000000e+00> : vector<16xf32>
    %19 = vector.multi_reduction <add>, %18, %cst_17 [1] : vector<16x128xf32> to vector<16xf32>
    %20 = vector.shape_cast %19 : vector<16xf32> to vector<16x1xf32>
    %c0_18 = arith.constant 0 : index
    %c0_19 = arith.constant 0 : index
    %21 = vector.load %arg4[%c0_18, %c0_19] : memref<16x1xf32, #tpu.memory_space<vmem>>, vector<16x1xf32>
    %22 = arith.addf %20, %21 : vector<16x1xf32>
    %cst_20 = arith.constant dense<0xFF800000> : vector<16xf32>
    %23 = vector.multi_reduction <maximumf>, %14, %cst_20 [1] : vector<16x128xf32> to vector<16xf32>
    %24 = vector.shape_cast %23 : vector<16xf32> to vector<16x1xf32>
    %25 = arith.maximumf %24, %22 : vector<16x1xf32>
    %26 = arith.subf %22, %25 : vector<16x1xf32>
    %27 = math.exp %26 : vector<16x1xf32>
    %28 = vector.broadcast %25 : vector<16x1xf32> to vector<16x128xf32>
    %29 = arith.subf %14, %28 : vector<16x128xf32>
    %30 = math.exp %29 : vector<16x128xf32>
    %cst_21 = arith.constant dense<0.000000e+00> : vector<16xf32>
    %31 = vector.multi_reduction <add>, %30, %cst_21 [1] : vector<16x128xf32> to vector<16xf32>
    %32 = vector.shape_cast %31 : vector<16xf32> to vector<16x1xf32>
    %33 = arith.addf %27, %32 : vector<16x1xf32>
    %34 = math.log %33 : vector<16x1xf32>
    %35 = arith.addf %25, %34 : vector<16x1xf32>
    %36 = arith.subf %35, %22 : vector<16x1xf32>
    %37 = tpu.iota {dimensions = array<i32: 0>} : vector<16x1xi32>
    %38 = vector.broadcast %0 : i32 to vector<16x1xi32>
    %39 = arith.addi %38, %37 : vector<16x1xi32>
    %c40_i32 = arith.constant 40 : i32
    %40 = vector.broadcast %c40_i32 : i32 to vector<16x1xi32>
    %41 = arith.cmpi slt, %39, %40 : vector<16x1xi32>
    %cst_22 = arith.constant 0.000000e+00 : f32
    %42 = vector.broadcast %cst_22 : f32 to vector<16x1xf32>
    %43 = arith.select %41, %36, %42 : vector<16x1xi1>, vector<16x1xf32>
    %44 = vector.shape_cast %43 : vector<16x1xf32> to vector<1x16x1xf32>
    %cst_23 = arith.constant dense<0.000000e+00> : vector<1xf32>
    %45 = vector.multi_reduction <add>, %44, %cst_23 [1, 2] : vector<1x16x1xf32> to vector<1xf32>
    %46 = vector.shape_cast %45 : vector<1xf32> to vector<1x1x1xf32>
    %47 = vector.extract %46[0, 0, 0] : f32 from vector<1x1x1xf32>
    %48 = vector.broadcast %47 : f32 to vector<1x8x128xf32>
    %c0_24 = arith.constant 0 : index
    %c0_25 = arith.constant 0 : index
    %c0_26 = arith.constant 0 : index
    %49 = vector.load %arg9[%c0_24, %c0_25, %c0_26] : memref<1x8x128xf32, #tpu.memory_space<vmem>>, vector<1x8x128xf32>
    tpu.vector_store %arg9[%c0_24, %c0_25, %c0_26], %48 {strides = array<i32>} : memref<1x8x128xf32, #tpu.memory_space<vmem>>, vector<1x8x128xf32>,
    return
  }
  func.func @transform_0(%arg0: i32, %arg1: memref<40xi32, #tpu.memory_space<smem>>) -> (i32, i32) {
    %c0_i32 = arith.constant 0 : i32
    %c0_i32_0 = arith.constant 0 : i32
    return %arg0, %c0_i32 : i32, i32
  }
  func.func @transform_1(%arg0: i32, %arg1: memref<40xi32, #tpu.memory_space<smem>>) -> (i32, i32) {
    %c0_i32 = arith.constant 0 : i32
    %c0_i32_0 = arith.constant 0 : i32
    return %arg0, %c0_i32 : i32, i32
  }
  func.func @transform_2(%arg0: i32, %arg1: memref<40xi32, #tpu.memory_space<smem>>) -> (i32, i32) {
    %c0_i32 = arith.constant 0 : i32
    %c0_i32_0 = arith.constant 0 : i32
    return %arg0, %c0_i32 : i32, i32
  }
  func.func @transform_3(%arg0: i32, %arg1: memref<40xi32, #tpu.memory_space<smem>>) -> (i32, i32) {
    %c0_i32 = arith.constant 0 : i32
    %c0_i32_0 = arith.constant 0 : i32
    %c0_i32_1 = arith.constant 0 : i32
    return %c0_i32, %c0_i32_0 : i32, i32
  }
  func.func @transform_4(%arg0: i32, %arg1: memref<40xi32, #tpu.memory_space<smem>>) -> (i32, i32) {
    %c0_i32 = arith.constant 0 : i32
    %c0_i32_0 = arith.constant 0 : i32
    %c0_i32_1 = arith.constant 0 : i32
    return %c0_i32, %c0_i32_0 : i32, i32
  }
  func.func @transform_5(%arg0: i32, %arg1: memref<40xi32, #tpu.memory_space<smem>>) -> (i32, i32) {
    %c0_i32 = arith.constant 0 : i32
    %c0_i32_0 = arith.constant 0 : i32
    %c0_i32_1 = arith.constant 0 : i32
    return %c0_i32, %c0_i32_0 : i32, i32
  }
  func.func @transform_7(%arg0: i32, %arg1: memref<40xi32, #tpu.memory_space<smem>>) -> (i32, i32, i32) {
    %c0_i32 = arith.constant 0 : i32
    %c0_i32_0 = arith.constant 0 : i32
    %c0_i32_1 = arith.constant 0 : i32
    return %arg0, %c0_i32, %c0_i32_0 : i32, i32, i32
  }
}

</mosaic_0001>

<bundles_post_ra>
// kernel: tpu_custom_call.1
= control target key start
LH: loop header
LB: loop body
LE: loop exit
PB: predicated region body
PF: predicated region fallthrough
CT: control target
= control target key end

     0   :  { %s1221_s0 = inlined_call_operand.vmem [shape: s32[40], index: 0, kind: input, shape index: {}]   ;;  %s1222_s1 = inlined_call_operand.vmem [shape: bf16[40,128], index: 1, kind: input, shape index: {}]   ;;  %s1223_s2 = inlined_call_operand.vmem [shape: s32[40,1], index: 2, kind: input, shape index: {}]   ;;  %s1224_s3 = inlined_call_operand.vmem [shape: f32[40,1], index: 3, kind: input, shape index: {}]   ;;  %s1225_s4 = inlined_call_operand.vmem [shape: bf16[128,128], index: 4, kind: input, shape index: {}]   ;;  %s1226_s5 = inlined_call_operand.vmem [shape: f32[1,128], index: 5, kind: input, shape index: {}]   ;;  %s1227_s6 = inlined_call_operand.vmem [shape: s32[1,128], index: 6, kind: input, shape index: {}]   ;;  %s1228_s7 = inlined_call_operand.hbm [shape: f32[512,128], index: 7, kind: input, shape index: {}]   ;;  %s1229_s8 = inlined_call_operand.hbm [shape: f32[3,8,128], index: 8, kind: output, shape index: {}]  }
   0x1   :  { %1234 = sst [smem:[#allocation18_spill]] %s1222_s1  ;;  %s13_s29 = sshll.u32 %s1221_s0, 4  ;;  %s14_s29 = int_to_ptr.vmem [resolvable:$true] %s13_s29 }
   0x2   :  { %1235 = sst [smem:[#allocation19_spill]] %s1223_s2  ;;  %s877_s30 = scalar_lea.vmem %s14_s29, 16 }
   0x3   :  { %1236 = sst [smem:[#allocation20_spill]] %s1224_s3  ;;  %p878_p0 = scmp.ne.s32.totalorder %s14_s29, %s877_s30 }
   0x4   :  { %p882_p1 = scmp.lt.s32.totalorder %s14_s29, %s14_s29  ;;  %p883_p2 = scmp.lt.s32.totalorder %s877_s30, %s877_s30 }
   0x6   :  { %p884_p3 = por %p883_p2, %p882_p1 }
   0x8   :  { %p885_p4 = pnand %p884_p3, %p878_p0 }
   0xa   :  { %888 = shalt.err (!%p885_p4)  }
   0xb   :  { %s993_s9 = smov [#allocation5]  }
   0xc   :  { %16 = dma.vmem_to_smem %s14_s29, 16, %s993_s9, [#allocation4] }
   0xd   :  { %961 = dma.done.wait [#allocation4], 16 }
   0xe   :  { %962 = vsyncadd [#allocation4], 4294967280 }
   0xf   :  { %18 = sfence }
  0x10   :  { %19 = vsyncpa [#allocation7], 0 }
  0x11   :  { %21 = vsyncpa [#allocation7 + $0x1], 0  ;;  %s1047_s10 = smov 0   ;;  %s1049_s11 = smov 0  }
  0x12   :  { %s1051_s0 = smov 0   ;;  %s1053_s12 = smov 0  }
  0x13 LB: > { %1237 = sst [smem:[#allocation15_spill]] %s979_s0  ;;  %s1068_s13 = sadd.s32 4294967295, %s983_s12   ;;  %s983_s12 = sphi %s1053_s12, %s1250_s12   ;;  %s979_s0 = sphi %s1051_s0, %s1252_s0   ;;  %s975_s11 = sphi %s1049_s11, %s1254_s11   ;;  %s971_s10 = sphi %s1047_s10, %s1253_s10  }
  0x14   : > { %s733_s14 = sadd.s32 4294967294, %s983_s12   ;;  %s1072_s15 = sadd.s32 1, %s983_s12  }
  0x15   : > { %1238 = sst [smem:[#allocation16_spill]] %s1072_s15  ;;  %s175_s16 = sadd.s32 1, %s979_s0 }
  0x16   : > { %s172_s17 = ssub.s32 %s983_s12, %s1072_s15  ;;  %p185_p5 = scmp.ne.s32.totalorder %s979_s0, %s975_s11 }
  0x17   : > { %p173_p6 = scmp.eq.s32.totalorder %s172_s17, 0  ;;  %p186_p7 = scmp.eq.s32.totalorder %s1068_s13, 2 }
  0x18   : > { %p191_p8 = scmp.ne.s32.totalorder %s975_s11, %s971_s10  ;;  %p192_p9 = scmp.eq.s32.totalorder %s733_s14, 2 }
  0x19   : > { %s1083_s18 = scalar_select %p173_p6, %s979_s0, %s175_s16  }
  0x1a   : > { %p1085_p10 = por %p186_p7, %p185_p5  ;;  %p1089_p11 = por %p192_p9, %p191_p8 }
  0x1b   : > { %1239 = sst [smem:[#allocation17_spill]] %s1083_s18  ;;  %p736_p12 = scmp.ge.s32.totalorder %s983_s12, 1 }
  0x1c   : > { %p270_p13 = scmp.lt.s32.totalorder %s983_s12, 4 }
  0x1e   : > { %p271_p0 = pnand %p736_p12, %p270_p13 }
  0x1f   : > { %s1230_s21 = sand.u32 (!%p271_p0), 1, %s975_s11   ;;  %s738_s22 = sshll.u32 (!%p271_p0), %s1068_s13, 1 }
  0x20   : > { %274 = sbr.rel (%p271_p0) target bundleno = 1014 (0x3f6), region = 44  ;;  %s1099_s23 = sshll.u32 (!%p271_p0), %s1230_s21, 3 }
  0x21   : > { %p327_p1 = scmp.lt.s32.totalorder (!%p271_p0), %s738_s22, 4  ;;  %s1242_s1 = sld [smem:[#allocation18_spill]] (!%p271_p0) }
  0x22   : > { %s1243_s2 = sld [smem:[#allocation19_spill]] (!%p271_p0)  ;;  %s1118_s24 = smov (!%p271_p0), 0  }
  0x23   : > { %s1244_s3 = sld [smem:[#allocation20_spill]] (!%p271_p0) }
  0x25   : > { %s1256_s22 = smov (!%p327_p1, %s738_s22), 4 }
  0x26   : > { %s739_s25 = sshll.u32 %s1256_s22, 2  ;;  %s741_s26 = sshll.u32 %s1256_s22, 3 }
  0x27   : > { %s1105_s29 = scalar_lea.vmem %s1242_s1, %s739_s25 }
  0x28   : > { %s1110_s14 = scalar_lea.vmem %s1243_s2, %s741_s26 }
  0x29   : > { %s1115_s21 = scalar_lea.vmem %s1244_s3, %s741_s26 }
  0x2a LB: >> { %s1245_s22 = sshll.u32 %s1068_s13, 4  ;;  %s378_s28 = scalar_lea.vmem [#allocation2], %s987_s24  ;;  %s987_s24 = sphi %s1118_s24, %s371_s24  }
  0x2b   : >> { %s372_s25 = sadd.s32 %s987_s24, %s1245_s22  ;;  %s386_s30 = sshll.u32 %s378_s28, 4  ;;  %s387_s30 = int_to_ptr.vmem [resolvable:$true] %s386_s30 }
  0x2c   : >> { %p373_p2 = scmp.lt.s32.totalorder %s372_s25, 39  ;;  %s891_s3 = scalar_lea.hbm %s1228_s7, 8192 }
  0x2e   : >> { %s1258_s25 = smov (!%p373_p2, %s372_s25), 39 }
  0x2f   : >> { %s375_s27 = sld [smem:[#allocation5 + %s1258_s25]] }
  0x35   : >> { %s745_s26 = sshll.u32 %s375_s27, 4 }
  0x36   : >> { %s377_s17 = scalar_lea.hbm %s1228_s7, %s745_s26 }
  0x37   : >> { %s889_s18 = scalar_lea.hbm %s377_s17, 16  ;;  %p892_p4 = scmp.lt.s32.totalorder %s377_s17, %s1228_s7 }
  0x38   : >> { %p890_p3 = scmp.ne.s32.totalorder %s377_s17, %s889_s18  ;;  %p893_p5 = scmp.lt.s32.totalorder %s891_s3, %s889_s18 }
  0x3a   : >> { %p894_p6 = por %p893_p5, %p892_p4 }
  0x3c   : >> { %p895_p7 = pnand %p894_p6, %p890_p3 }
  0x3e   : >> { %898 = shalt.err (!%p895_p7)  }
  0x3f   : >> { %s899_s22 = scalar_lea.vmem %s387_s30, 16  ;;  %s994_s25 = smov [#allocation2]  }
  0x40   : >> { %p900_p8 = scmp.ne.s32.totalorder %s387_s30, %s899_s22  ;;  %s901_s27 = sshll.u32 %s994_s25, 4  ;;  %s902_s27 = int_to_ptr.vmem [resolvable:$false] %s901_s27 }
  0x41   : >> { %s903_s28 = scalar_lea.vmem %s902_s27, 256  ;;  %p904_p9 = scmp.lt.s32.totalorder %s387_s30, %s902_s27 }
  0x42   : >> { %p905_p12 = scmp.lt.s32.totalorder %s903_s28, %s899_s22 }
  0x44   : >> { %p906_p13 = por %p905_p12, %p904_p9 }
  0x46   : >> { %p907_p0 = pnand %p906_p13, %p900_p8 }
  0x48   : >> { %910 = shalt.err (!%p907_p0)  }
  0x49   : >> { %389 = dma.hbm_to_vmem [thread:$0]  %s377_s17, 16, %s387_s30, [#allocation3] }
  0x4a   : >> { %s371_s24 = sadd.s32 1, %s987_s24  }
  0x4b   : >> { %p368_p1 = scmp.ge.s32.totalorder %s371_s24, 16  }
  0x4c   : > { %v853_v0 = vld [vmem:[%s1225_s4 + $0x38] sm:$0xff] (%p368_p1)   ;;  %v995_v1 = vmov (%p368_p1), 0.0   ;;  %vm996_vm0 = vmmov (%p368_p1), 0   ;;  %v997_v2 = vmov (%p368_p1), 0   ;;  %v854_v3 = vld [vmem:[%s1225_s4 + $0x30] sm:$0xff] (%p368_p1)   ;;  %v511_v4 = vld [vmem:[%s1110_s14] sm:$0xff] (%p368_p1) }
  0x4d   : > { %370 = sbr.rel (!%p368_p1) target bundleno = 42 (0x2a), region = 105  ;;  %771 = vmatprep.subr.bf16.mxu0 (%p368_p1), %v995_v1  ;;  %787 = vmatprep.mubr.msk.bf16.mxu0 (%p368_p1), %vm996_vm0, %v995_v1  ;;  %v512_v5 = vld [vmem:[%s1110_s14 + $0x8] sm:$0xff] (%p368_p1)  ;;  %v856_v7 = vld [vmem:[%s1225_s4 + $0x20] sm:$0xff] (%p368_p1)   ;;  %v857_v8 = vld [vmem:[%s1225_s4 + $0x18] sm:$0xff] (%p368_p1)  }
  0x4e   : > { %772 = vmatpush3.bf16.xpose.msra.mxu0 (%p368_p1), %v853_v0  ;;  %852 = vset.pattern.permute.xlu0 (%p368_p1), %v997_v2  ;;  %v855_v6 = vld [vmem:[%s1225_s4 + $0x28] sm:$0xff] (%p368_p1)   ;;  %v858_v9 = vld [vmem:[%s1225_s4 + $0x10] sm:$0xff] (%p368_p1)   ;;  %v860_v11 = vld [vmem:[%s1225_s4] sm:$0xff] (%p368_p1)  }
  0x4f   : > { %773 = vmatprep.subr.bf16.mxu0 (%p368_p1), %v995_v1  ;;  %518 = vperm.xlu0 (%p368_p1), %852, %v511_v4   ;;  %v859_v10 = vld [vmem:[%s1225_s4 + $0x8] sm:$0xff] (%p368_p1)   ;;  %v390_v12 = vld [vmem:[%s1105_s29] sm:$0xff] (%p368_p1)   ;;  %s989_s29 = smov (%p368_p1), 0  }
  0x50   : > { %v756_v14 = vld [vmem:[%s1227_s6] ss:$0 sm:$0xff] (%p368_p1) }
  0x51   : > { %v746_v15 = vld [vmem:[%s1226_s5] ss:$0 sm:$0xff] (%p368_p1) }
  0x53   : > { %521 = vperm.xlu0 %852, %v512_v5  }
  0x56   : > { %774 = vmatpush3.bf16.xpose.msra.mxu0 %v854_v3 }
  0x57   : > { %775 = vmatprep.subr.bf16.mxu0 %v995_v1 }
  0x5e   : > { %776 = vmatpush3.bf16.xpose.msra.mxu0 %v855_v6 }
  0x5f   : > { %777 = vmatprep.subr.bf16.mxu0 %v995_v1 }
  0x66   : > { %778 = vmatpush3.bf16.xpose.msra.mxu0 %v856_v7 }
  0x67   : > { %779 = vmatprep.subr.bf16.mxu0 %v995_v1 }
  0x6e   : > { %780 = vmatpush3.bf16.xpose.msra.mxu0 %v857_v8 }
  0x6f   : > { %781 = vmatprep.subr.bf16.mxu0 %v995_v1 }
  0x76   : > { %782 = vmatpush3.bf16.xpose.msra.mxu0 %v858_v9 }
  0x77   : > { %783 = vmatprep.subr.bf16.mxu0 %v995_v1 }
  0x7e   : > { %784 = vmatpush3.bf16.xpose.msra.mxu0 %v859_v10 }
  0x7f   : > { %785 = vmatprep.subr.bf16.mxu0 %v995_v1 }
  0x86   : > { %786 = vmatpush3.bf16.xpose.msra.mxu0 %v860_v11 }
  0x8d   : > { %788 = vmatmul.mubr.bf16.vlgmr.msra.gmra.mxu0 %v390_v12 }
  0xca   : > { %v519_v13 = vpop.permute.xlu0 %518 }
  0xcb   : > { %vm523_vm1 = vcmp.eq.s32.totalorder %v756_v14, %v519_v13 }
  0xce   : > { %v522_v20 = vpop.permute.xlu0 %521 }
  0xcf   : > { %vm524_vm2 = vcmp.eq.s32.totalorder %v756_v14, %v522_v20 }
 0x14d   : > { %v503_v16 = vpop.f32.mrf.mxu0 }
 0x14e   : > { %v504_v17 = vadd.f32 %v746_v15, %v503_v16 }
 0x14f   : > { %v789_v18 = vpop.f32.mrf.mxu0 }
 0x150   : > { %v525_v19 = vsel %vm523_vm1, -10000.0, %v504_v17 }
 0x151   : > { %v506_v21 = vpop.f32.mrf.mxu0 }
 0x152   : > { %v507_v22 = vadd.f32 %v746_v15, %v506_v21 }
 0x153   : > { %v790_v23 = vpop.f32.mrf.mxu0 }
 0x154   : > { %v526_v24 = vsel %vm524_vm2, -10000.0, %v507_v22 }
 0x155 LB: >> { %963 = dma.done.wait [#allocation3], 16  ;;  %s991_s29 = sphi %s989_s29, %s532_s29  }
 0x156   : >> { %964 = vsyncadd [#allocation3], 4294967280  ;;  %s532_s29 = sadd.s32 1, %s991_s29  }
 0x157   : >> { %p529_p2 = scmp.ge.s32.totalorder %s532_s29, 16  }
 0x158   : > { %v536_v25 = vunpack.c.l.bf16 (%p529_p2), %v390_v12  ;;  %v538_v26 = vld [vmem:[#allocation2] sm:$0xff] (%p529_p2)  ;;  %550 = vmax.xlane.f32.xlu1 (%p529_p2), %v525_v19  ;;  %v537_v27 = vunpack.c.h.bf16 (%p529_p2), %v390_v12  ;;  %863 = vset.pattern.permute.xlu0 (%p529_p2), %v997_v2  ;;  %v539_v28 = vld [vmem:[#allocation2 + $0x8] sm:$0xff] (%p529_p2)  ;;  %v592_v59 = vlaneseq (%p529_p2)  ;;  %vm602_vm5 = vcmask (%p529_p2), 7168   ;;  %s758_s0 = sshll.u32 (%p529_p2), %s1068_s13, 7  ;;  %s1247_s15 = scalar_lea.vmem (%p529_p2), [#allocation6], %s1099_s23 }
 0x159   : > { %531 = sbr.rel (!%p529_p2) target bundleno = 341 (0x155), region = 116  ;;  %864 = vset.pattern.permute.xlu1 (%p529_p2), %v997_v2  ;;  %v546_v31 = vld [vmem:[%s1115_s21] sm:$0xff] (%p529_p2)  ;;  %v547_v35 = vld [vmem:[%s1115_s21 + $0x8] sm:$0xff] (%p529_p2)  ;;  %s1246_s21 = sshll.u32 (%p529_p2), %s1068_s13, 4 }
 0x15a   : > { %v540_v29 = vmul.f32 (%p529_p2), %v538_v26, %v536_v25  ;;  %v541_v30 = vmul.f32 (%p529_p2), %v539_v28, %v537_v27  ;;  %v593_v60 = vshrl.u32 (%p529_p2), %v592_v59, 7  ;;  %v595_v61 = vstv (%p529_p2), %s1246_s21  ;;  %s631_s18 = sshll.u32 (%p529_p2), %s1247_s15, 4  ;;  %s1182_s26 = scalar_lea.hbm (%p529_p2), %s1229_s8, %s758_s0  ;;  %s632_s18 = int_to_ptr.vmem [resolvable:$true] %s631_s18 }
 0x15b   : > { %s1248_s14 = smov (%p529_p2), %s1247_s15  ;;  %s1249_s16 = sand.u32 (%p529_p2), 1, %s975_s11  }
 0x15c   : > { %542 = vadd.xlane.f32.xlu0 (%p529_p2), %v540_v29  ;;  %552 = vmax.xlane.f32.xlu1 (%p529_p2), %v526_v24  ;;  %v594_v63 = vadd.s32 (%p529_p2), 8, %v593_v60  ;;  %v596_v1 = vadd.s32 (%p529_p2), %v595_v61, %v593_v60  ;;  %s618_s17 = scalar_lea.sflag (%p529_p2), [#allocation7], %s1249_s16  ;;  %s911_s22 = scalar_lea.vmem (%p529_p2), %s632_s18, 128 }
 0x15d   : > { %p912_p3 = scmp.ne.s32.totalorder (%p529_p2), %s632_s18, %s911_s22  ;;  %s998_s13 = smov (%p529_p2), [#allocation6]  }
 0x15e   : > { %v597_v4 = vadd.s32 %v595_v61, %v594_v63  ;;  %vm598_vm3 = vcmp.lt.s32.totalorder %v596_v1, 40  ;;  %s915_s25 = sshll.u32 %s998_s13, 4  ;;  %s916_s25 = int_to_ptr.vmem [resolvable:$false] %s915_s25 }
 0x15f   : > { %p913_p4 = pnand %p912_p3, %p1085_p10  ;;  %s917_s27 = scalar_lea.vmem %s916_s25, 256 }
 0x160   : > { %544 = vadd.xlane.f32.xlu0 %v541_v30  ;;  %vm599_vm4 = vcmp.lt.s32.totalorder %v597_v4, 40  ;;  %p918_p6 = scmp.lt.s32.totalorder %s632_s18, %s916_s25  ;;  %p919_p7 = scmp.lt.s32.totalorder %s917_s27, %s911_s22 }
 0x161   : > { %p914_p5 = pneg %p913_p4 }
 0x162   : > { %p920_p8 = por %p919_p7, %p918_p6 }
 0x164   : > { %p921_p9 = pnand %p920_p8, %p914_p5 }
 0x1e1   : > { %v551_v32 = vpop.xlane.xlu1 %550 }
 0x1e5   : > { %v543_v33 = vpop.xlane.xlu0 %542  ;;  %v553_v38 = vpop.xlane.xlu1 %552 }
 0x1e6   : > { %v548_v34 = vadd.f32 %v546_v31, %v543_v33 }
 0x1e8   : > { %v554_v36 = vmax.f32 %v551_v32, %v548_v34 }
 0x1e9   : > { %v545_v37 = vpop.xlane.xlu0 %544 }
 0x1ea   : > { %v549_v39 = vadd.f32 %v547_v35, %v545_v37  ;;  %564 = vperm.xlu0 %863, %v554_v36   ;;  %v556_v49 = vsub.f32 %v548_v34, %v554_v36 }
 0x1ec   : > { %v555_v40 = vmax.f32 %v553_v38, %v549_v39  ;;  %v558_v50 = vmul.f32 1.442695, %v556_v49 }
 0x1ee   : > { %569 = vperm.xlu1 %864, %v555_v40   ;;  %v557_v51 = vsub.f32 %v549_v39, %v555_v40 }
 0x1f0   : > { %v560_v52 = vmul.f32 1.442695, %v557_v51 }
 0x265   : > { %v565_v41 = vpop.permute.xlu0 %564 }
 0x266   : > { %v572_v42 = vsub.f32 %v525_v19, %v565_v41 }
 0x268   : > { %v574_v43 = vmul.f32 1.442695, %v572_v42 }
 0x269   : > { %v570_v44 = vpop.permute.xlu1 %569 }
 0x26a   : > { %865 = vpow2.f32 %v574_v43  ;;  %v573_v45 = vsub.f32 %v526_v24, %v570_v44 }
 0x26c   : > { %v576_v46 = vmul.f32 1.442695, %v573_v45 }
 0x26e   : > { %867 = vpow2.f32 %v576_v46 }
 0x26f   : > { %869 = vpow2.f32 %v558_v50 }
 0x270   : > { %871 = vpow2.f32 %v560_v52 }
 0x277   : > { %v866_v47 = vpop.eup %865 }
 0x278   : > { %578 = vadd.xlane.f32.xlu1 %v866_v47 }
 0x27b   : > { %v868_v48 = vpop.eup %867 }
 0x27c   : > { %580 = vadd.xlane.f32.xlu0 %v868_v48  ;;  %v870_v53 = vpop.eup %869 }
 0x27d   : > { %v872_v56 = vpop.eup %871 }
 0x301   : > { %v579_v54 = vpop.xlane.xlu1 %578 }
 0x302   : > { %v582_v55 = vadd.f32 %v870_v53, %v579_v54 }
 0x304   : > { %873 = vlog2.f32 %v582_v55 }
 0x305   : > { %v581_v57 = vpop.xlane.xlu0 %580 }
 0x306   : > { %v583_v58 = vadd.f32 %v872_v56, %v581_v57 }
 0x308   : > { %875 = vlog2.f32 %v583_v58 }
 0x311   : > { %v874_v62 = vpop.eup %873 }
 0x312   : > { %v585_v0 = vmul.f32 0.6931472, %v874_v62 }
 0x314   : > { %v588_v2 = vadd.f32 %v585_v0, %v554_v36 }
 0x315   : > { %v876_v3 = vpop.eup %875 }
 0x316   : > { %v587_v5 = vmul.f32 0.6931472, %v876_v3  ;;  %v590_v6 = vsub.f32 %v588_v2, %v548_v34 }
 0x318   : > { %v589_v7 = vadd.f32 %v587_v5, %v555_v40  ;;  %v600_v9 = vsel %vm598_vm3, %v590_v6, 0.0 }
 0x319   : > { %v603_v11 = vsel %vm602_vm5, %v600_v9, 0.0 }
 0x31a   : > { %v591_v8 = vsub.f32 %v589_v7, %v549_v39 }
 0x31c   : > { %v601_v10 = vsel %vm599_vm4, %v591_v8, 0.0 }
 0x31d   : > { %v604_v12 = vsel %vm602_vm5, %v601_v10, 0.0 }
 0x31e   : > { %v605_v13 = vadd.f32 %v604_v12, %v603_v11 }
 0x320   : > { %606 = vadd.xlane.f32.xlu1 %v605_v13 }
 0x3a9   : > { %v607_v14 = vpop.xlane.xlu1 %606 }
 0x3aa   : > { %v608_v15 = vrot.slane %v607_v14, 4 }
 0x3ac   : > { %v609_v16 = vadd.f32 %v608_v15, %v607_v14 }
 0x3ae   : > { %v610_v17 = vrot.slane %v609_v16, 2 }
 0x3b0   : > { %v611_v18 = vadd.f32 %v610_v17, %v609_v16 }
 0x3b2   : > { %v612_v19 = vrot.slane %v611_v18, 1 }
 0x3b4   : > { %v613_v20 = vadd.f32 %v612_v19, %v611_v18 }
 0x3b6   : > { %791 = vpush %v613_v20 }
 0x3e7   : > { %s792_s9 = spop %791 }
 0x3e8   : > { %v615_v21 = vstv %s792_s9 }
 0x3e9   : > { %616 = vst [vmem:[%s1248_s14] sm:$0xff] %v615_v21 }
 0x3ea   : > { %924 = shalt.err (!%p921_p9)
}
 0x3eb   : > { %s925_s23 = scalar_lea.hbm %s1182_s26, 128  ;;  %s929_s2 = scalar_lea.hbm %s1229_s8, 384 }
 0x3ec   : > { %p926_p12 = scmp.ne.s32.totalorder %s1182_s26, %s925_s23  ;;  %p930_p1 = scmp.lt.s32.totalorder %s1182_s26, %s1229_s8 }
 0x3ed   : > { %p931_p2 = scmp.lt.s32.totalorder %s929_s2, %s925_s23 }
 0x3ee   : > { %p927_p13 = pnand %p926_p12, %p1085_p10 }
 0x3ef   : > { %p932_p3 = por %p931_p2, %p930_p1 }
 0x3f0   : > { %p928_p0 = pneg %p927_p13 }
 0x3f2   : > { %p933_p4 = pnand %p932_p3, %p928_p0 }
 0x3f4   : > { %936 = shalt.err (!%p933_p4)
}
 0x3f5   : > { %793 = dma.vmem_to_hbm [thread:$0]  (%p1085_p10), %s632_s18, 128, %s1182_s26, %s618_s17  }
 0x3f6 PF: > { %p799_p5 = scmp.ge.s32.totalorder %s983_s12, 2  ;;  %s643_s21 = sand.u32 1, %s971_s10  }
 0x3f7   : > { %s644_s0 = scalar_lea.sflag [#allocation7], %s643_s21 }
 0x3f8   : > { %p796_p6 = pnand %p799_p5, %p1089_p11 }
 0x3fa   : > { %p797_p7 = pneg %p796_p6 }
 0x3fc   : > { %966 = dma.done.wait (%p797_p7), %s644_s0, 128  }
 0x3fd   : > { %968 = vsyncadd (%p797_p7), %s644_s0, 4294967168  ;;  %s1250_s12 = sld [smem:[#allocation16_spill]]  ;;  %s1253_s10 = smov %s975_s11 }
 0x3fe   : > { %s1251_s15 = sld [smem:[#allocation15_spill]] }
 0x3ff   : > { %s1252_s0 = sld [smem:[#allocation17_spill]] }
 0x403   : > { %p24_p8 = scmp.ge.s32.totalorder %s1250_s12, 5  }
 0x404   : > { %s1254_s11 = smov %s1251_s15 }
 0x405   :  { %26 = sbr.rel (!%p24_p8) target bundleno = 19 (0x13), region = 127 }
 0x40a   :  { %649 = vsyncpa [#allocation7], 1 }
 0x40b   :  { %651 = vsyncpa [#allocation7 + $0x1], 1 }
 0x40c   :  { %652 = vsyncmov [#allocation3] }
 0x40f   :  { %s653_s19 = vpop.sfrf %652 }
 0x410   :  { %p761_p10 = scmp.ne.s32.totalorder %s653_s19, 0 }
 0x412   :  { %657 = shalt.err (%p761_p10)  }

</bundles_post_ra>
